<compile_context>
chip_gen: v6e
topology: v6e:2x2x1
jax: 0.10.0
libtpu: 0.0.40
codegen_flags: <defaults>
</compile_context>

<pallas_src>
import jax
import jax.numpy as jnp
from jax.experimental import pallas as pl
from jax.experimental.pallas import tpu as pltpu


def _dma_flatten_kernel(src_ref, dst_ref, sem):
    # Whole-buffer copy (HBM -> HBM). The flatten is pure data movement with no
    # compute to fuse, so a single contiguous DMA descriptor is the floor for a
    # materializing implementation: zero VMEM staging, zero grid-step overhead.
    cp = pltpu.make_async_copy(src_ref, dst_ref, sem)
    cp.start()
    cp.wait()


def flatten_caps(p, a):
    B, C, H, W, P = p.shape
    assert a.shape == (B, C, H, W)

    Mp, Np = H * W * P, C          # torch: poses = p.view(B, H*W*P, -1)
    Ep = C * H * W * P             # elements per batch in the pose tensor

    # activations = a.view(B, C*H*W, 1): contiguous reshape -> metadata only, no kernel.
    activations = jnp.reshape(a, (B, C * H * W, 1))

    # poses = p.view(B, H*W*P, C): identical contiguous row-major element order, so
    # the reshape below is metadata-only. The pallas_call then performs the (optional)
    # materializing copy as ONE whole-buffer HBM->HBM DMA (review recommendation #2).
    # TODO(synk): in a real model, drop the pallas_call entirely and return this
    # reshape directly — zero bytes moved beats any kernel.
    p_in = jnp.reshape(p, (B, Mp, Np))

    itemsize = jnp.dtype(p.dtype).itemsize
    poses = pl.pallas_call(
        _dma_flatten_kernel,
        out_shape=jax.ShapeDtypeStruct((B, Mp, Np), p.dtype),
        in_specs=[pl.BlockSpec(memory_space=pl.ANY)],   # raw ref, no auto-DMA/tiling
        out_specs=pl.BlockSpec(memory_space=pl.ANY),
        scratch_shapes=[pltpu.SemaphoreType.DMA(())],
        cost_estimate=pl.CostEstimate(
            flops=0, transcendentals=0, bytes_accessed=2 * B * Ep * itemsize),
    )(p_in)

    return poses, activations


if __name__ == "__main__":
    # FlattenCaps has no learnable parameters.
    key = jax.random.PRNGKey(0)
    kp, ka = jax.random.split(key)

    B, C, H, W, P = 2, 8, 4, 4, 16
    p = jax.random.normal(kp, (B, C, H, W, P), dtype=jnp.float32)
    a = jax.random.uniform(ka, (B, C, H, W), dtype=jnp.float32)

    poses, activations = jax.block_until_ready(flatten_caps(p, a))

    # Reference: exactly what torch .view produces on contiguous tensors
    # (raw row-major reinterpretation — the spec module does NOT permute).
    poses_ref = jnp.reshape(p, (B, H * W * P, C))
    act_ref = jnp.reshape(a, (B, C * H * W, 1))

    assert poses.shape == (B, H * W * P, C) and poses.dtype == p.dtype
    assert activations.shape == (B, C * H * W, 1) and activations.dtype == a.dtype
    assert bool(jnp.array_equal(poses, poses_ref))
    assert bool(jnp.array_equal(activations, act_ref))

    print("KERNEL_OK")
</pallas_src>

<mosaic_0001>
module attributes {stable_mosaic.version = 11 : i64} {
  func.func @_dma_flatten_kernel(%arg0: memref<2x256x8xf32, #tpu.memory_space<any>>, %arg1: memref<2x256x8xf32, #tpu.memory_space<any>>, %arg2: memref<!tpu.dma_semaphore, #tpu.memory_space<semaphore_mem>>) attributes {dimension_semantics = [], scalar_prefetch = 0 : i64, scratch_operands = 1 : i64, tpu.core_type = #tpu.core_type<tc>} {
    tpu.enqueue_dma source(%arg0 : memref<2x256x8xf32, #tpu.memory_space<any>>) target(%arg1 : memref<2x256x8xf32, #tpu.memory_space<any>>) target_semaphore(%arg2 : memref<!tpu.dma_semaphore, #tpu.memory_space<semaphore_mem>>)
    tpu.wait_dma2 semaphore(%arg2 : memref<!tpu.dma_semaphore, #tpu.memory_space<semaphore_mem>>) src(%arg0 : memref<2x256x8xf32, #tpu.memory_space<any>>) dst(%arg1 : memref<2x256x8xf32, #tpu.memory_space<any>>)
    return
  }
}

</mosaic_0001>

<bundles_post_ra>
// kernel: tpu_custom_call.1
= control target key start
LH: loop header
LB: loop body
LE: loop exit
PB: predicated region body
PF: predicated region fallthrough
CT: control target
= control target key end

     0   :  { %s590_s0 = inlined_call_operand.vmem [shape: f32[2,256,8], index: 0, kind: input, shape index: {}]   ;;  %s591_s1 = inlined_call_operand.vmem [shape: f32[2,256,8], index: 1, kind: output, shape index: {}]  }
   0x1   :  { %v39_v0 = vld [vmem:[%s590_s0] sm:$0xff]  ;;  %v41_v1 = vld [vmem:[%s590_s0 + $0x8] sm:$0xff]  ;;  %v43_v2 = vld [vmem:[%s590_s0 + $0x10] sm:$0xff] }
   0x2   :  { %40 = vst [vmem:[%s591_s1] sm:$0xff] %v39_v0  ;;  %42 = vst [vmem:[%s591_s1 + $0x8] sm:$0xff] %v41_v1  ;;  %v45_v3 = vld [vmem:[%s590_s0 + $0x18] sm:$0xff]  ;;  %v47_v4 = vld [vmem:[%s590_s0 + $0x20] sm:$0xff] }
   0x3   :  { %44 = vst [vmem:[%s591_s1 + $0x10] sm:$0xff] %v43_v2  ;;  %v49_v5 = vld [vmem:[%s590_s0 + $0x28] sm:$0xff]  ;;  %46 = vst [vmem:[%s591_s1 + $0x18] sm:$0xff] %v45_v3  ;;  %v51_v6 = vld [vmem:[%s590_s0 + $0x30] sm:$0xff] }
   0x4   :  { %48 = vst [vmem:[%s591_s1 + $0x20] sm:$0xff] %v47_v4  ;;  %50 = vst [vmem:[%s591_s1 + $0x28] sm:$0xff] %v49_v5  ;;  %v53_v7 = vld [vmem:[%s590_s0 + $0x38] sm:$0xff]  ;;  %v55_v8 = vld [vmem:[%s590_s0 + $0x40] sm:$0xff] }
   0x5   :  { %52 = vst [vmem:[%s591_s1 + $0x30] sm:$0xff] %v51_v6  ;;  %54 = vst [vmem:[%s591_s1 + $0x38] sm:$0xff] %v53_v7  ;;  %v57_v9 = vld [vmem:[%s590_s0 + $0x48] sm:$0xff]  ;;  %v59_v10 = vld [vmem:[%s590_s0 + $0x50] sm:$0xff] }
   0x6   :  { %56 = vst [vmem:[%s591_s1 + $0x40] sm:$0xff] %v55_v8  ;;  %v61_v11 = vld [vmem:[%s590_s0 + $0x58] sm:$0xff]  ;;  %58 = vst [vmem:[%s591_s1 + $0x48] sm:$0xff] %v57_v9  ;;  %v63_v12 = vld [vmem:[%s590_s0 + $0x60] sm:$0xff] }
   0x7   :  { %60 = vst [vmem:[%s591_s1 + $0x50] sm:$0xff] %v59_v10  ;;  %62 = vst [vmem:[%s591_s1 + $0x58] sm:$0xff] %v61_v11  ;;  %v65_v13 = vld [vmem:[%s590_s0 + $0x68] sm:$0xff]  ;;  %v67_v14 = vld [vmem:[%s590_s0 + $0x70] sm:$0xff] }
   0x8   :  { %64 = vst [vmem:[%s591_s1 + $0x60] sm:$0xff] %v63_v12  ;;  %66 = vst [vmem:[%s591_s1 + $0x68] sm:$0xff] %v65_v13  ;;  %v69_v15 = vld [vmem:[%s590_s0 + $0x78] sm:$0xff]  ;;  %v71_v16 = vld [vmem:[%s590_s0 + $0x80] sm:$0xff] }
   0x9   :  { %68 = vst [vmem:[%s591_s1 + $0x70] sm:$0xff] %v67_v14  ;;  %v73_v17 = vld [vmem:[%s590_s0 + $0x88] sm:$0xff]  ;;  %70 = vst [vmem:[%s591_s1 + $0x78] sm:$0xff] %v69_v15  ;;  %v75_v18 = vld [vmem:[%s590_s0 + $0x90] sm:$0xff] }
   0xa   :  { %72 = vst [vmem:[%s591_s1 + $0x80] sm:$0xff] %v71_v16  ;;  %74 = vst [vmem:[%s591_s1 + $0x88] sm:$0xff] %v73_v17  ;;  %v77_v19 = vld [vmem:[%s590_s0 + $0x98] sm:$0xff]  ;;  %v79_v20 = vld [vmem:[%s590_s0 + $0xa0] sm:$0xff] }
   0xb   :  { %76 = vst [vmem:[%s591_s1 + $0x90] sm:$0xff] %v75_v18  ;;  %78 = vst [vmem:[%s591_s1 + $0x98] sm:$0xff] %v77_v19  ;;  %v81_v21 = vld [vmem:[%s590_s0 + $0xa8] sm:$0xff]  ;;  %v83_v22 = vld [vmem:[%s590_s0 + $0xb0] sm:$0xff] }
   0xc   :  { %80 = vst [vmem:[%s591_s1 + $0xa0] sm:$0xff] %v79_v20  ;;  %v85_v23 = vld [vmem:[%s590_s0 + $0xb8] sm:$0xff]  ;;  %82 = vst [vmem:[%s591_s1 + $0xa8] sm:$0xff] %v81_v21  ;;  %v87_v24 = vld [vmem:[%s590_s0 + $0xc0] sm:$0xff] }
   0xd   :  { %84 = vst [vmem:[%s591_s1 + $0xb0] sm:$0xff] %v83_v22  ;;  %86 = vst [vmem:[%s591_s1 + $0xb8] sm:$0xff] %v85_v23  ;;  %v89_v25 = vld [vmem:[%s590_s0 + $0xc8] sm:$0xff]  ;;  %v91_v26 = vld [vmem:[%s590_s0 + $0xd0] sm:$0xff] }
   0xe   :  { %88 = vst [vmem:[%s591_s1 + $0xc0] sm:$0xff] %v87_v24  ;;  %90 = vst [vmem:[%s591_s1 + $0xc8] sm:$0xff] %v89_v25  ;;  %v93_v27 = vld [vmem:[%s590_s0 + $0xd8] sm:$0xff]  ;;  %v95_v28 = vld [vmem:[%s590_s0 + $0xe0] sm:$0xff] }
   0xf   :  { %92 = vst [vmem:[%s591_s1 + $0xd0] sm:$0xff] %v91_v26  ;;  %v97_v29 = vld [vmem:[%s590_s0 + $0xe8] sm:$0xff]  ;;  %94 = vst [vmem:[%s591_s1 + $0xd8] sm:$0xff] %v93_v27  ;;  %v99_v30 = vld [vmem:[%s590_s0 + $0xf0] sm:$0xff] }
  0x10   :  { %96 = vst [vmem:[%s591_s1 + $0xe0] sm:$0xff] %v95_v28  ;;  %98 = vst [vmem:[%s591_s1 + $0xe8] sm:$0xff] %v97_v29  ;;  %v101_v31 = vld [vmem:[%s590_s0 + $0xf8] sm:$0xff]  ;;  %v103_v32 = vld [vmem:[%s590_s0 + $0x100] sm:$0xff] }
  0x11   :  { %100 = vst [vmem:[%s591_s1 + $0xf0] sm:$0xff] %v99_v30  ;;  %102 = vst [vmem:[%s591_s1 + $0xf8] sm:$0xff] %v101_v31  ;;  %v105_v33 = vld [vmem:[%s590_s0 + $0x108] sm:$0xff]  ;;  %v107_v34 = vld [vmem:[%s590_s0 + $0x110] sm:$0xff] }
  0x12   :  { %104 = vst [vmem:[%s591_s1 + $0x100] sm:$0xff] %v103_v32  ;;  %v109_v35 = vld [vmem:[%s590_s0 + $0x118] sm:$0xff]  ;;  %106 = vst [vmem:[%s591_s1 + $0x108] sm:$0xff] %v105_v33  ;;  %v111_v36 = vld [vmem:[%s590_s0 + $0x120] sm:$0xff] }
  0x13   :  { %108 = vst [vmem:[%s591_s1 + $0x110] sm:$0xff] %v107_v34  ;;  %110 = vst [vmem:[%s591_s1 + $0x118] sm:$0xff] %v109_v35  ;;  %v113_v37 = vld [vmem:[%s590_s0 + $0x128] sm:$0xff]  ;;  %v115_v38 = vld [vmem:[%s590_s0 + $0x130] sm:$0xff] }
  0x14   :  { %112 = vst [vmem:[%s591_s1 + $0x120] sm:$0xff] %v111_v36  ;;  %114 = vst [vmem:[%s591_s1 + $0x128] sm:$0xff] %v113_v37  ;;  %v117_v39 = vld [vmem:[%s590_s0 + $0x138] sm:$0xff]  ;;  %v119_v40 = vld [vmem:[%s590_s0 + $0x140] sm:$0xff] }
  0x15   :  { %116 = vst [vmem:[%s591_s1 + $0x130] sm:$0xff] %v115_v38  ;;  %v121_v41 = vld [vmem:[%s590_s0 + $0x148] sm:$0xff]  ;;  %118 = vst [vmem:[%s591_s1 + $0x138] sm:$0xff] %v117_v39  ;;  %v123_v42 = vld [vmem:[%s590_s0 + $0x150] sm:$0xff] }
  0x16   :  { %120 = vst [vmem:[%s591_s1 + $0x140] sm:$0xff] %v119_v40  ;;  %122 = vst [vmem:[%s591_s1 + $0x148] sm:$0xff] %v121_v41  ;;  %v125_v43 = vld [vmem:[%s590_s0 + $0x158] sm:$0xff]  ;;  %v127_v44 = vld [vmem:[%s590_s0 + $0x160] sm:$0xff] }
  0x17   :  { %124 = vst [vmem:[%s591_s1 + $0x150] sm:$0xff] %v123_v42  ;;  %126 = vst [vmem:[%s591_s1 + $0x158] sm:$0xff] %v125_v43  ;;  %v129_v45 = vld [vmem:[%s590_s0 + $0x168] sm:$0xff]  ;;  %v131_v46 = vld [vmem:[%s590_s0 + $0x170] sm:$0xff] }
  0x18   :  { %128 = vst [vmem:[%s591_s1 + $0x160] sm:$0xff] %v127_v44  ;;  %v133_v47 = vld [vmem:[%s590_s0 + $0x178] sm:$0xff]  ;;  %130 = vst [vmem:[%s591_s1 + $0x168] sm:$0xff] %v129_v45  ;;  %v135_v48 = vld [vmem:[%s590_s0 + $0x180] sm:$0xff] }
  0x19   :  { %132 = vst [vmem:[%s591_s1 + $0x170] sm:$0xff] %v131_v46  ;;  %134 = vst [vmem:[%s591_s1 + $0x178] sm:$0xff] %v133_v47  ;;  %v137_v49 = vld [vmem:[%s590_s0 + $0x188] sm:$0xff]  ;;  %v139_v50 = vld [vmem:[%s590_s0 + $0x190] sm:$0xff] }
  0x1a   :  { %136 = vst [vmem:[%s591_s1 + $0x180] sm:$0xff] %v135_v48  ;;  %138 = vst [vmem:[%s591_s1 + $0x188] sm:$0xff] %v137_v49  ;;  %v141_v51 = vld [vmem:[%s590_s0 + $0x198] sm:$0xff]  ;;  %v143_v52 = vld [vmem:[%s590_s0 + $0x1a0] sm:$0xff] }
  0x1b   :  { %140 = vst [vmem:[%s591_s1 + $0x190] sm:$0xff] %v139_v50  ;;  %v145_v53 = vld [vmem:[%s590_s0 + $0x1a8] sm:$0xff]  ;;  %142 = vst [vmem:[%s591_s1 + $0x198] sm:$0xff] %v141_v51  ;;  %v147_v54 = vld [vmem:[%s590_s0 + $0x1b0] sm:$0xff] }
  0x1c   :  { %144 = vst [vmem:[%s591_s1 + $0x1a0] sm:$0xff] %v143_v52  ;;  %146 = vst [vmem:[%s591_s1 + $0x1a8] sm:$0xff] %v145_v53  ;;  %v149_v55 = vld [vmem:[%s590_s0 + $0x1b8] sm:$0xff]  ;;  %v151_v56 = vld [vmem:[%s590_s0 + $0x1c0] sm:$0xff] }
  0x1d   :  { %148 = vst [vmem:[%s591_s1 + $0x1b0] sm:$0xff] %v147_v54  ;;  %150 = vst [vmem:[%s591_s1 + $0x1b8] sm:$0xff] %v149_v55  ;;  %v153_v57 = vld [vmem:[%s590_s0 + $0x1c8] sm:$0xff]  ;;  %v155_v58 = vld [vmem:[%s590_s0 + $0x1d0] sm:$0xff] }
  0x1e   :  { %152 = vst [vmem:[%s591_s1 + $0x1c0] sm:$0xff] %v151_v56  ;;  %v157_v59 = vld [vmem:[%s590_s0 + $0x1d8] sm:$0xff]  ;;  %154 = vst [vmem:[%s591_s1 + $0x1c8] sm:$0xff] %v153_v57  ;;  %v159_v60 = vld [vmem:[%s590_s0 + $0x1e0] sm:$0xff] }
  0x1f   :  { %156 = vst [vmem:[%s591_s1 + $0x1d0] sm:$0xff] %v155_v58  ;;  %158 = vst [vmem:[%s591_s1 + $0x1d8] sm:$0xff] %v157_v59  ;;  %v161_v61 = vld [vmem:[%s590_s0 + $0x1e8] sm:$0xff]  ;;  %v163_v62 = vld [vmem:[%s590_s0 + $0x1f0] sm:$0xff] }
  0x20   :  { %160 = vst [vmem:[%s591_s1 + $0x1e0] sm:$0xff] %v159_v60  ;;  %162 = vst [vmem:[%s591_s1 + $0x1e8] sm:$0xff] %v161_v61  ;;  %v165_v63 = vld [vmem:[%s590_s0 + $0x1f8] sm:$0xff] }
  0x21   :  { %164 = vst [vmem:[%s591_s1 + $0x1f0] sm:$0xff] %v163_v62  ;;  %166 = vst [vmem:[%s591_s1 + $0x1f8] sm:$0xff] %v165_v63 }
  0x22   :  { %174 = vsyncadd [#allocation2], 8192 }
  0x23   :  { %194 = dma.done.wait [#allocation2], 8192 }
  0x24   :  { %195 = vsyncadd [#allocation2], 4294959104 }
  0x25   :  { %179 = vsyncmov [#allocation2] }
  0x28   :  { %s180_s30 = vpop.sfrf %179 }
  0x29   :  { %p193_p0 = scmp.ne.s32.totalorder %s180_s30, 0 }
  0x2b   :  { %184 = shalt.err (%p193_p0)  }

</bundles_post_ra>
